<compile_context>
chip_gen: v6e
topology: v6e:2x2x1
jax: 0.10.0
libtpu: 0.0.40
codegen_flags: <defaults>
</compile_context>

<pallas_src>
import math

import jax
import jax.numpy as jnp
from jax.experimental import pallas as pl
from jax.experimental.pallas import tpu as pltpu


def _round_up(x: int, m: int) -> int:
    return ((x + m - 1) // m) * m


def _qlinear_kernel(x_ref, w_ref, sb_ref, o_ref, acc_ref):
    # x_ref:  (tm, tk) bf16      activation tile
    # w_ref:  (tk, tn) int8      pre-transposed weight tile
    # sb_ref: (2,  tn) f32       row 0 = per-channel scale, row 1 = bias
    # o_ref:  (tm, tn) f32       output tile (resident across the k axis)
    # acc_ref:(tm, tn) f32       VMEM accumulator scratch
    k = pl.program_id(2)

    @pl.when(k == 0)
    def _():
        acc_ref[...] = jnp.zeros_like(acc_ref)

    acc_ref[...] += jnp.dot(
        x_ref[...],
        w_ref[...].astype(jnp.bfloat16),   # int8 -> bf16, full-rate MXU path
        preferred_element_type=jnp.float32,
    )

    @pl.when(k == pl.num_programs(2) - 1)
    def _():
        scale = sb_ref[0:1, :]
        bias = sb_ref[1:2, :]
        o_ref[...] = (acc_ref[...] * scale + bias).astype(o_ref.dtype)


class QuantizedLinear:
    """JAX/Pallas equivalent of intel_npu_acceleration_library QuantizedLinear."""

    def __init__(self, weight, scale, bias=None, *,
                 tm_max: int = 512, tn_max: int = 256, tk_max: int = 512):
        if weight.dtype != jnp.int8:
            # TODO(synk): packed-uint8 (int4) weight path of the NPU library is not implemented.
            raise RuntimeError(f"Quantized weight must be int8, got {weight.dtype}")

        self.outC, self.inC = weight.shape
        N, K = self.outC, self.inC

        # Lane-aligned tile sizes; padded extents fixed at init so the one-time
        # weight transpose/pad is amortized over every forward call.
        self.tm_max = tm_max
        self.tn = min(tn_max, _round_up(N, 128))
        self.tk = min(tk_max, _round_up(K, 128))
        self.Np = _round_up(N, self.tn)
        self.Kp = _round_up(K, self.tk)

        # Pre-transpose once to the MXU-native (K, N) layout; weight stays int8 in HBM.
        w_t = jnp.asarray(weight).T  # (K, N) int8
        if self.Kp != K or self.Np != N:
            w_t = jnp.pad(w_t, ((0, self.Kp - K), (0, self.Np - N)))
        self.weight_t = w_t

        # The torch module stores scale * sqrt(inC) and the backend divides by sqrt(inC):
        # the factors cancel, so the net per-channel dequant scale is just `scale`.
        s = jnp.asarray(scale, jnp.float32).reshape(1, N)
        b = (jnp.zeros((1, N), jnp.float32) if bias is None
             else jnp.asarray(bias, jnp.float32).reshape(1, N))
        sb = jnp.concatenate([s, b], axis=0)  # (2, N): scale row, bias row
        if self.Np != N:
            sb = jnp.pad(sb, ((0, 0), (0, self.Np - N)))
        self.scale_bias = sb

    def __call__(self, x):
        lead = x.shape[:-1]
        K = x.shape[-1]
        assert K == self.inC, (K, self.inC)
        M = int(math.prod(lead)) if lead else 1
        N = self.outC
        Kp, Np = self.Kp, self.Np
        tn, tk = self.tn, self.tk

        # bf16 activations: halves x HBM/VMEM traffic and matches the bf16 MXU path.
        x2 = x.reshape(M, K).astype(jnp.bfloat16)
        tm = min(self.tm_max, _round_up(max(M, 1), 16))
        Mp = _round_up(M, tm)
        if Mp != M or Kp != K:
            x2 = jnp.pad(x2, ((0, Mp - M), (0, Kp - K)))

        grid = (Mp // tm, Np // tn, Kp // tk)

        out = pl.pallas_call(
            _qlinear_kernel,
            out_shape=jax.ShapeDtypeStruct((Mp, Np), jnp.float32),
            grid_spec=pltpu.PrefetchScalarGridSpec(
                num_scalar_prefetch=0,
                grid=grid,
                in_specs=[
                    pl.BlockSpec((tm, tk), lambda i, j, k: (i, k)),   # x tile (bf16)
                    pl.BlockSpec((tk, tn), lambda i, j, k: (k, j)),   # weight tile (int8)
                    pl.BlockSpec((2, tn), lambda i, j, k: (0, j)),    # [scale; bias] rows
                ],
                out_specs=pl.BlockSpec((tm, tn), lambda i, j, k: (i, j)),
                scratch_shapes=[pltpu.VMEM((tm, tn), jnp.float32)],   # f32 accumulator
            ),
            compiler_params=pltpu.CompilerParams(
                dimension_semantics=("parallel", "parallel", "arbitrary"),
                vmem_limit_bytes=32 * 1024 * 1024,
            ),
        )(x2, self.weight_t, self.scale_bias)

        if Mp != M or Np != N:
            out = out[:M, :N]
        return out.reshape(*lead, N)


if __name__ == "__main__":
    key = jax.random.PRNGKey(0)
    k_w, k_s, k_b, k_x = jax.random.split(key, 4)

    batch, seq, inC, outC = 2, 8, 32, 16

    weight = jax.random.randint(k_w, (outC, inC), -128, 128, dtype=jnp.int32).astype(
        jnp.int8
    )
    scale = jax.random.uniform(k_s, (outC, 1), jnp.float32, 0.001, 0.01)
    bias = jax.random.normal(k_b, (outC,), jnp.float32)
    x = jax.random.normal(k_x, (batch, seq, inC), jnp.float32)

    layer = QuantizedLinear(weight, scale, bias)
    out = layer(x)
    out = jax.block_until_ready(out)
    assert out.shape == (batch, seq, outC), out.shape

    # Reference (matching the kernel's bf16 activation cast):
    #   out = x_bf16 @ (w * scale).T + bias
    xb = x.reshape(-1, inC).astype(jnp.bfloat16).astype(jnp.float32)
    ref = xb @ (weight.astype(jnp.float32) * scale).T + bias
    ref = ref.reshape(batch, seq, outC)
    assert jnp.allclose(out, ref, atol=2e-3, rtol=2e-3), (
        float(jnp.max(jnp.abs(out - ref)))
    )

    # No-bias path sanity check.
    layer_nb = QuantizedLinear(weight, scale, None)
    out_nb = jax.block_until_ready(layer_nb(x))
    ref_nb = (xb @ (weight.astype(jnp.float32) * scale).T).reshape(batch, seq, outC)
    assert jnp.allclose(out_nb, ref_nb, atol=2e-3, rtol=2e-3)

    print("KERNEL_OK")
</pallas_src>

<mosaic_0001>
module attributes {stable_mosaic.version = 11 : i64} {
  func.func @_qlinear_kernel(%arg0: i32, %arg1: i32, %arg2: i32, %arg3: memref<16x128xbf16, #tpu.memory_space<vmem>>, %arg4: memref<128x128xi8, #tpu.memory_space<vmem>>, %arg5: memref<2x128xf32, #tpu.memory_space<vmem>>, %arg6: memref<16x128xf32, #tpu.memory_space<vmem>>, %arg7: memref<16x128xf32, #tpu.memory_space<vmem>>) attributes {dimension_semantics = [#tpu.dimension_semantics<parallel>, #tpu.dimension_semantics<parallel>, #tpu.dimension_semantics<arbitrary>], iteration_bounds = array<i64: 1, 1, 1>, scalar_prefetch = 0 : i64, scratch_operands = 1 : i64, tpu.core_type = #tpu.core_type<tc>, window_params = [{transform_indices = @transform_0, window_bounds = array<i64: 16, 128>}, {transform_indices = @transform_1, window_bounds = array<i64: 128, 128>}, {transform_indices = @transform_2, window_bounds = array<i64: 2, 128>}, {transform_indices = @transform_3, window_bounds = array<i64: 16, 128>}]} {
    %c0_i32 = arith.constant 0 : i32
    %0 = arith.cmpi eq, %arg2, %c0_i32 : i32
    %1 = arith.extui %0 : i1 to i32
    %c0_i32_0 = arith.constant 0 : i32
    %2 = arith.cmpi ne, %1, %c0_i32_0 : i32
    scf.if %2 {
      %cst_10 = arith.constant 0.000000e+00 : f32
      %13 = vector.broadcast %cst_10 : f32 to vector<16x128xf32>
      %c0_11 = arith.constant 0 : index
      %c0_12 = arith.constant 0 : index
      %14 = vector.load %arg7[%c0_11, %c0_12] : memref<16x128xf32, #tpu.memory_space<vmem>>, vector<16x128xf32>
      tpu.vector_store %arg7[%c0_11, %c0_12], %13 {strides = array<i32>} : memref<16x128xf32, #tpu.memory_space<vmem>>, vector<16x128xf32>,
    } else {
    }
    %c0 = arith.constant 0 : index
    %c0_1 = arith.constant 0 : index
    %3 = vector.load %arg7[%c0, %c0_1] : memref<16x128xf32, #tpu.memory_space<vmem>>, vector<16x128xf32>
    %c0_2 = arith.constant 0 : index
    %c0_3 = arith.constant 0 : index
    %4 = vector.load %arg3[%c0_2, %c0_3] : memref<16x128xbf16, #tpu.memory_space<vmem>>, vector<16x128xbf16>
    %c0_4 = arith.constant 0 : index
    %c0_5 = arith.constant 0 : index
    %5 = vector.load %arg4[%c0_4, %c0_5] : memref<128x128xi8, #tpu.memory_space<vmem>>, vector<128x128xi8>
    %6 = arith.sitofp %5 : vector<128x128xi8> to vector<128x128xbf16>
    %cst = arith.constant dense<0.000000e+00> : vector<16x128xf32>
    %7 = tpu.matmul %4, %6, %cst {dimension_numbers = #tpu.dot_dimension_numbers<[1], [0], [0], [1], [0, 0, 1, 1], [], []>} : vector<16x128xbf16>, vector<128x128xbf16>, vector<16x128xf32> -> vector<16x128xf32>
    %8 = arith.addf %3, %7 : vector<16x128xf32>
    %c0_6 = arith.constant 0 : index
    %c0_7 = arith.constant 0 : index
    %9 = vector.load %arg7[%c0_6, %c0_7] : memref<16x128xf32, #tpu.memory_space<vmem>>, vector<16x128xf32>
    tpu.vector_store %arg7[%c0_6, %c0_7], %8 {strides = array<i32>} : memref<16x128xf32, #tpu.memory_space<vmem>>, vector<16x128xf32>,
    %c0_i32_8 = arith.constant 0 : i32
    %10 = arith.cmpi eq, %arg2, %c0_i32_8 : i32
    %11 = arith.extui %10 : i1 to i32
    %c0_i32_9 = arith.constant 0 : i32
    %12 = arith.cmpi ne, %11, %c0_i32_9 : i32
    scf.if %12 {
      %c0_10 = arith.constant 0 : index
      %c0_11 = arith.constant 0 : index
      %13 = vector.load %arg5[%c0_10, %c0_11] : memref<2x128xf32, #tpu.memory_space<vmem>>, vector<1x128xf32>
      %c1 = arith.constant 1 : index
      %c0_12 = arith.constant 0 : index
      %14 = vector.load %arg5[%c1, %c0_12] : memref<2x128xf32, #tpu.memory_space<vmem>>, vector<1x128xf32>
      %c0_13 = arith.constant 0 : index
      %c0_14 = arith.constant 0 : index
      %15 = vector.load %arg7[%c0_13, %c0_14] : memref<16x128xf32, #tpu.memory_space<vmem>>, vector<16x128xf32>
      %16 = vector.broadcast %13 : vector<1x128xf32> to vector<16x128xf32>
      %17 = arith.mulf %15, %16 : vector<16x128xf32>
      %18 = vector.broadcast %14 : vector<1x128xf32> to vector<16x128xf32>
      %19 = arith.addf %17, %18 : vector<16x128xf32>
      %c0_15 = arith.constant 0 : index
      %c0_16 = arith.constant 0 : index
      %20 = vector.load %arg6[%c0_15, %c0_16] : memref<16x128xf32, #tpu.memory_space<vmem>>, vector<16x128xf32>
      tpu.vector_store %arg6[%c0_15, %c0_16], %19 {strides = array<i32>} : memref<16x128xf32, #tpu.memory_space<vmem>>, vector<16x128xf32>,
    } else {
    }
    return
  }
  func.func @transform_0(%arg0: i32, %arg1: i32, %arg2: i32) -> (i32, i32) {
    %c0_i32 = arith.constant 0 : i32
    return %arg0, %arg2 : i32, i32
  }
  func.func @transform_1(%arg0: i32, %arg1: i32, %arg2: i32) -> (i32, i32) {
    %c0_i32 = arith.constant 0 : i32
    return %arg2, %arg1 : i32, i32
  }
  func.func @transform_2(%arg0: i32, %arg1: i32, %arg2: i32) -> (i32, i32) {
    %c0_i32 = arith.constant 0 : i32
    %c0_i32_0 = arith.constant 0 : i32
    return %c0_i32, %arg1 : i32, i32
  }
  func.func @transform_3(%arg0: i32, %arg1: i32, %arg2: i32) -> (i32, i32) {
    %c0_i32 = arith.constant 0 : i32
    return %arg0, %arg1 : i32, i32
  }
}

</mosaic_0001>

<bundles_post_ra>
// kernel: tpu_custom_call.1
= control target key start
LH: loop header
LB: loop body
LE: loop exit
PB: predicated region body
PF: predicated region fallthrough
CT: control target
= control target key end

     0   :  { %8 = vsyncpa [#allocation4], 0  ;;  %s314_s0 = inlined_call_operand.hbm [shape: bf16[16,128], index: 0, kind: input, shape index: {}]   ;;  %s315_s1 = inlined_call_operand.hbm [shape: s8[128,128], index: 1, kind: input, shape index: {}]   ;;  %s316_s2 = inlined_call_operand.vmem [shape: f32[2,128], index: 2, kind: input, shape index: {}]   ;;  %s317_s3 = inlined_call_operand.hbm [shape: f32[16,128], index: 3, kind: output, shape index: {}]  }
   0x1   :  { %9 = vsyncpa [#allocation7], 0 }
   0x2   :  { %10 = vsyncpa [#allocation5], 0  ;;  %s264_s12 = smov [#allocation3]  }
   0x3   :  { %s16_s13 = sshll.u32 %s264_s12, 4  ;;  %s17_s13 = int_to_ptr.vmem [resolvable:$true] %s16_s13 }
   0x4   :  { %s206_s14 = scalar_lea.vmem %s17_s13, 128  ;;  %p211_p1 = scmp.lt.s32.totalorder %s17_s13, %s17_s13 }
   0x5   :  { %p207_p0 = scmp.ne.s32.totalorder %s17_s13, %s206_s14  ;;  %p212_p2 = scmp.lt.s32.totalorder %s206_s14, %s206_s14 }
   0x7   :  { %p213_p3 = por %p212_p2, %p211_p1 }
   0x9   :  { %p214_p4 = pnand %p213_p3, %p207_p0 }
   0xb   :  { %217 = shalt.err (!%p214_p4)
}
   0xc   :  { %s265_s15 = smov 64   ;;  %s266_s16 = smov 4  }
   0xd   :  { %22 = dma.hbm_to_vmem [thread:$0]  %s314_s0, 128, %s17_s13, [#allocation4], %s265_s15, %s265_s15, %s266_s16  }
   0xe   :  { %s267_s19 = smov [#allocation6]  }
   0xf   :  { %s28_s20 = sshll.u32 %s267_s19, 4  ;;  %s29_s20 = int_to_ptr.vmem [resolvable:$true] %s28_s20 }
  0x10   :  { %s226_s21 = scalar_lea.vmem %s29_s20, 512  ;;  %p231_p6 = scmp.lt.s32.totalorder %s29_s20, %s29_s20 }
  0x11   :  { %p227_p5 = scmp.ne.s32.totalorder %s29_s20, %s226_s21  ;;  %p232_p7 = scmp.lt.s32.totalorder %s226_s21, %s226_s21 }
  0x13   :  { %p233_p8 = por %p232_p7, %p231_p6 }
  0x15   :  { %p234_p9 = pnand %p233_p8, %p227_p5 }
  0x17   :  { %237 = shalt.err (!%p234_p9)
}
  0x18   :  { %s268_s22 = smov 128   ;;  %s269_s23 = smov 8  }
  0x19   :  { %34 = dma.hbm_to_vmem [thread:$0]  %s315_s1, 512, %s29_s20, [#allocation7], %s268_s22, %s268_s22, %s269_s23  }
  0x1a   :  { %258 = dma.done.wait [#allocation4], 128  }
  0x1b   :  { %259 = vsyncadd [#allocation4], 4294967168 }
  0x1c   :  { %260 = dma.done.wait [#allocation7], 512  }
  0x1d   :  { %261 = vsyncadd [#allocation7], 4294966784  ;;  %v270_v0 = vmov 0.0   ;;  %vm271_vm0 = vmmov 0   ;;  %v57_v1 = vld [vmem:[#allocation6 + $0x18] sm:$0xff]  ;;  %v56_v4 = vld [vmem:[#allocation6 + $0x10] sm:$0xff] }
  0x1e   :  { %168 = vmatprep.subr.bf16.mxu0 %v270_v0  ;;  %184 = vmatprep.mubr.msk.bf16.mxu0 %vm271_vm0, %v270_v0  ;;  %v65_v2 = vunpack.c.h.s8.bf16 %v57_v1  ;;  %v64_v3 = vunpack.c.l.s8.bf16 %v57_v1  ;;  %v63_v5 = vunpack.c.h.s8.bf16 %v56_v4  ;;  %v62_v6 = vunpack.c.l.s8.bf16 %v56_v4  ;;  %v55_v7 = vld [vmem:[#allocation6 + $0x8] sm:$0xff]  ;;  %v54_v10 = vld [vmem:[#allocation6] sm:$0xff]  ;;  %v197_v13 = vld [vmem:[#allocation3] sm:$0xff]   ;;  %s272_s28 = smov [#allocation8]  }
  0x1f   :  { %v61_v8 = vunpack.c.h.s8.bf16 %v55_v7  ;;  %v60_v9 = vunpack.c.l.s8.bf16 %v55_v7  ;;  %v59_v11 = vunpack.c.h.s8.bf16 %v54_v10  ;;  %v58_v12 = vunpack.c.l.s8.bf16 %v54_v10  ;;  %v157_v14 = vld [vmem:[%s316_s2] ss:$0 sm:$0xff]  ;;  %v158_v16 = vld [vmem:[%s316_s2 + $0x1] ss:$0 sm:$0xff]  ;;  %s143_s29 = sshll.u32 %s272_s28, 4  ;;  %s144_s29 = int_to_ptr.vmem [resolvable:$true] %s143_s29 }
  0x20   :  { %169 = vmatpush3.bf16.msra.mxu0 %v65_v2  ;;  %s238_s30 = scalar_lea.vmem %s144_s29, 256  ;;  %p243_p11 = scmp.lt.s32.totalorder %s144_s29, %s144_s29 }
  0x21   :  { %170 = vmatprep.subr.bf16.mxu0 %v270_v0  ;;  %p239_p10 = scmp.ne.s32.totalorder %s144_s29, %s238_s30  ;;  %p244_p12 = scmp.lt.s32.totalorder %s238_s30, %s238_s30 }
  0x23   :  { %p245_p13 = por %p244_p12, %p243_p11 }
  0x24   :  { %171 = vmatpush3.bf16.msra.mxu0 %v64_v3 }
  0x25   :  { %172 = vmatprep.subr.bf16.mxu0 %v270_v0  ;;  %p246_p0 = pnand %p245_p13, %p239_p10 }
  0x28   :  { %173 = vmatpush3.bf16.msra.mxu0 %v63_v5 }
  0x29   :  { %174 = vmatprep.subr.bf16.mxu0 %v270_v0 }
  0x2c   :  { %175 = vmatpush3.bf16.msra.mxu0 %v62_v6 }
  0x2d   :  { %176 = vmatprep.subr.bf16.mxu0 %v270_v0 }
  0x30   :  { %177 = vmatpush3.bf16.msra.mxu0 %v61_v8 }
  0x31   :  { %178 = vmatprep.subr.bf16.mxu0 %v270_v0 }
  0x34   :  { %179 = vmatpush3.bf16.msra.mxu0 %v60_v9 }
  0x35   :  { %180 = vmatprep.subr.bf16.mxu0 %v270_v0 }
  0x38   :  { %181 = vmatpush3.bf16.msra.mxu0 %v59_v11 }
  0x39   :  { %182 = vmatprep.subr.bf16.mxu0 %v270_v0 }
  0x3c   :  { %183 = vmatpush3.bf16.msra.mxu0 %v58_v12 }
  0x3f   :  { %185 = vmatmul.mubr.bf16.vlgmr.msra.gmra.mxu0 %v197_v13 }
  0xff   :  { %v106_v15 = vpop.f32.mrf.mxu0 }
 0x100   :  { %v128_v17 = vmul.f32 %v157_v14, %v106_v15 }
 0x101   :  { %v186_v18 = vpop.f32.mrf.mxu0 }
 0x102   :  { %v134_v19 = vadd.f32 %v158_v16, %v128_v17 }
 0x103   :  { %v109_v20 = vpop.f32.mrf.mxu0 }
 0x104   :  { %136 = vst [vmem:[#allocation8] sm:$0xff] %v134_v19  ;;  %v129_v21 = vmul.f32 %v157_v14, %v109_v20 }
 0x105   :  { %v187_v22 = vpop.f32.mrf.mxu0 }
 0x106   :  { %v135_v23 = vadd.f32 %v158_v16, %v129_v21 }
 0x108   :  { %137 = vst [vmem:[#allocation8 + $0x8] sm:$0xff] %v135_v23 }
 0x109   :  { %249 = shalt.err (!%p246_p0)
}
 0x10a   :  { %149 = dma.vmem_to_hbm [thread:$0]  %s144_s29, 256, %s317_s3, [#allocation5], %s268_s22, %s268_s22, %s269_s23  }
 0x10b   :  { %262 = dma.done.wait [#allocation5], 256  }
 0x10c   :  { %263 = vsyncadd [#allocation5], 4294967040 }
 0x10d   :  { %153 = vsyncpa [#allocation4], 1 }
 0x10e   :  { %154 = vsyncpa [#allocation7], 1 }
 0x10f   :  { %155 = vsyncpa [#allocation5], 1 }

</bundles_post_ra>
